<compile_context>
chip_gen: v7x
topology: tpu7x:2x2x1
jax: 0.10.0
libtpu: 0.0.40
codegen_flags: <defaults>
</compile_context>

<pallas_src>
import functools

import jax
import jax.numpy as jnp
from jax.experimental import pallas as pl
from jax.experimental.pallas import tpu as pltpu


def _mha_attn_kernel(q_ref, x_ref, o_ref, *, hw_valid):
    # q_ref: (num_heads, C)        -- block-diagonal query, resident in VMEM
    # x_ref: (Bt, C, HW_pad)       -- batch tile of features (spatial flattened)
    # o_ref: (Bt, num_heads, HW_pad)
    q = q_ref[...]                                        # (num_heads, C)
    bt, _, hw_pad = x_ref.shape
    nh = q.shape[0]

    needs_mask = hw_pad != hw_valid
    if needs_mask:
        col = jax.lax.broadcasted_iota(jnp.int32, (nh, hw_pad), 1)

    for bi in range(bt):  # small static unroll (Bt capped in the wrapper)
        # One MXU matmul covers all heads: (num_heads, C) @ (C, HW)
        logits = jnp.dot(q, x_ref[bi],
                         preferred_element_type=jnp.float32)   # (nh, hw_pad)
        if needs_mask:
            logits = jnp.where(col < hw_valid, logits, -jnp.inf)

        # numerically-stable softmax over the flattened spatial axis
        m = jnp.max(logits, axis=-1, keepdims=True)
        e = jnp.exp(logits - m)
        s = jnp.sum(e, axis=-1, keepdims=True)
        o_ref[bi] = e * pl.reciprocal(s, approx=True)           # EUP slot


def _choose_batch_tile(B, per_batch_bytes, budget_bytes=8 << 20,
                       max_unroll=16, min_steps=2):
    """Largest divisor of B that fits the VMEM budget, keeps the inner unroll
    bounded, and (when possible) leaves >= 2 grid steps for megacore."""
    cap = max(1, min(max_unroll, budget_bytes // max(per_batch_bytes, 1)))
    bt = 1
    for d in range(1, B + 1):
        if B % d != 0 or d > cap:
            continue
        if B // d < min_steps and B >= min_steps:
            continue
        bt = d
    return bt


def multi_head_attention(features, query, num_heads):
    """features: (B, C, H, W); query: (num_heads, head_dim). Returns f32."""
    B, C, H, W = features.shape
    head_dim = C // num_heads
    HW = H * W
    HW_pad = pl.cdiv(HW, 128) * 128          # lane-dense last axis

    # glue reshape / pad in plain JAX (layout plumbing, no compute)
    x = features.reshape(B, C, HW)
    if HW_pad != HW:
        x = jnp.pad(x, ((0, 0), (0, 0), (0, HW_pad - HW)))

    # Block-diagonal query: q_blk[h, h*head_dim:(h+1)*head_dim] = query[h].
    # One (num_heads, C) @ (C, HW) matmul then gives every head's logits.
    eye = jnp.eye(num_heads, dtype=query.dtype)
    q_blk = (eye[:, :, None] * query[:, None, :]).reshape(num_heads, C)

    itemsize = jnp.dtype(x.dtype).itemsize
    per_batch_bytes = C * HW_pad * itemsize + num_heads * HW_pad * 4
    bt = _choose_batch_tile(B, per_batch_bytes)

    out = pl.pallas_call(
        functools.partial(_mha_attn_kernel, hw_valid=HW),
        out_shape=jax.ShapeDtypeStruct((B, num_heads, HW_pad), jnp.float32),
        grid_spec=pltpu.PrefetchScalarGridSpec(
            num_scalar_prefetch=0,
            grid=(B // bt,),
            in_specs=[
                # query: constant block index -> DMA'd once, VMEM-resident
                pl.BlockSpec((num_heads, C), lambda b: (0, 0)),
                # features: one batch tile, all channels, full spatial extent
                pl.BlockSpec((bt, C, HW_pad), lambda b: (b, 0, 0)),
            ],
            # sublane/lane-dense output slab: (num_heads, HW_pad) per batch
            out_specs=pl.BlockSpec((bt, num_heads, HW_pad), lambda b: (b, 0, 0)),
        ),
        compiler_params=pltpu.CompilerParams(
            dimension_semantics=("parallel",),
            vmem_limit_bytes=64 * 1024 * 1024),
    )(q_blk, x)

    if HW_pad != HW:
        out = out[:, :, :HW]
    return out.reshape(B, num_heads, H, W)

    # TODO(synk): the downstream AttentionLoss consumer could be fused into the
    # epilogue here to avoid a full HBM round-trip of the attention maps.


def _reference(features, query, num_heads):
    B, C, H, W = features.shape
    head_dim = C // num_heads
    x = features.reshape(B, num_heads, head_dim, H * W)
    logits = jnp.einsum("bhdn,hd->bhn", x, query)
    attn = jax.nn.softmax(logits, axis=-1)
    return attn.reshape(B, num_heads, H, W)


if __name__ == "__main__":
    # small shapes consistent with the module
    B, C, H, W = 2, 32, 16, 16
    num_heads = 8
    head_dim = C // num_heads

    key = jax.random.PRNGKey(0)
    kx, kq = jax.random.split(key)
    features = jax.random.normal(kx, (B, C, H, W), dtype=jnp.float32)
    # deterministic parameter init (torch.randn(num_heads, head_dim) analogue)
    query = jax.random.normal(kq, (num_heads, head_dim), dtype=jnp.float32)

    out = multi_head_attention(features, query, num_heads)
    out = jax.block_until_ready(out)

    ref = _reference(features, query, num_heads)
    assert out.shape == (B, num_heads, H, W)
    # approx reciprocal in the softmax normalizer -> slightly relaxed tolerance
    assert jnp.allclose(out, ref, atol=2e-3, rtol=2e-3), \
        float(jnp.max(jnp.abs(out - ref)))

    print("KERNEL_OK")
</pallas_src>

<mosaic_0001>
module attributes {stable_mosaic.version = 11 : i64} {
  func.func @_mha_attn_kernel(%arg0: i32, %arg1: memref<8x32xf32, #tpu.memory_space<vmem>>, %arg2: memref<1x32x256xf32, #tpu.memory_space<vmem>>, %arg3: memref<1x8x256xf32, #tpu.memory_space<vmem>>) attributes {dimension_semantics = [#tpu.dimension_semantics<parallel>], iteration_bounds = array<i64: 2>, scalar_prefetch = 0 : i64, scratch_operands = 0 : i64, tpu.core_type = #tpu.core_type<tc>, window_params = [{pipeline_mode = #tpu.pipeline_mode<synchronous>, transform_indices = @transform_0, window_bounds = array<i64: 8, 32>}, {transform_indices = @transform_1, window_bounds = array<i64: 1, 32, 256>}, {transform_indices = @transform_2, window_bounds = array<i64: 1, 8, 256>}]} {
    %c0 = arith.constant 0 : index
    %c0_0 = arith.constant 0 : index
    %0 = vector.load %arg1[%c0, %c0_0] : memref<8x32xf32, #tpu.memory_space<vmem>>, vector<8x32xf32>
    %c0_1 = arith.constant 0 : index
    %c0_2 = arith.constant 0 : index
    %c0_3 = arith.constant 0 : index
    %1 = vector.load %arg2[%c0_1, %c0_2, %c0_3] : memref<1x32x256xf32, #tpu.memory_space<vmem>>, vector<1x32x256xf32>
    %2 = vector.shape_cast %1 : vector<1x32x256xf32> to vector<32x256xf32>
    %cst = arith.constant dense<0.000000e+00> : vector<8x256xf32>
    %3 = tpu.matmul %0, %2, %cst {dimension_numbers = #tpu.dot_dimension_numbers<[1], [0], [0], [1], [0, 0, 1, 1], [], []>} : vector<8x32xf32>, vector<32x256xf32>, vector<8x256xf32> -> vector<8x256xf32>
    %cst_4 = arith.constant dense<0xFF800000> : vector<8xf32>
    %4 = vector.multi_reduction <maximumf>, %3, %cst_4 [1] : vector<8x256xf32> to vector<8xf32>
    %5 = vector.shape_cast %4 : vector<8xf32> to vector<8x1xf32>
    %6 = vector.broadcast %5 : vector<8x1xf32> to vector<8x256xf32>
    %7 = arith.subf %3, %6 : vector<8x256xf32>
    %8 = math.exp %7 : vector<8x256xf32>
    %cst_5 = arith.constant dense<0.000000e+00> : vector<8xf32>
    %9 = vector.multi_reduction <add>, %8, %cst_5 [1] : vector<8x256xf32> to vector<8xf32>
    %10 = vector.shape_cast %9 : vector<8xf32> to vector<8x1xf32>
    %11 = tpu.reciprocal %10 {approx = true} : vector<8x1xf32> -> vector<8x1xf32>
    %12 = vector.broadcast %11 : vector<8x1xf32> to vector<8x256xf32>
    %13 = arith.mulf %8, %12 : vector<8x256xf32>
    %c0_6 = arith.constant 0 : index
    %c0_7 = arith.constant 0 : index
    %c0_8 = arith.constant 0 : index
    %14 = vector.load %arg3[%c0_6, %c0_7, %c0_8] : memref<1x8x256xf32, #tpu.memory_space<vmem>>, vector<1x8x256xf32>
    %15 = vector.shape_cast %14 : vector<1x8x256xf32> to vector<8x256xf32>
    %16 = vector.shape_cast %13 : vector<8x256xf32> to vector<1x8x256xf32>
    tpu.vector_store %arg3[%c0_6, %c0_7, %c0_8], %16 {strides = array<i32>} : memref<1x8x256xf32, #tpu.memory_space<vmem>>, vector<1x8x256xf32>,
    return
  }
  func.func @transform_0(%arg0: i32) -> (i32, i32) {
    %c0_i32 = arith.constant 0 : i32
    %c0_i32_0 = arith.constant 0 : i32
    %c0_i32_1 = arith.constant 0 : i32
    return %c0_i32, %c0_i32_0 : i32, i32
  }
  func.func @transform_1(%arg0: i32) -> (i32, i32, i32) {
    %c0_i32 = arith.constant 0 : i32
    %c0_i32_0 = arith.constant 0 : i32
    %c0_i32_1 = arith.constant 0 : i32
    return %arg0, %c0_i32, %c0_i32_0 : i32, i32, i32
  }
  func.func @transform_2(%arg0: i32) -> (i32, i32, i32) {
    %c0_i32 = arith.constant 0 : i32
    %c0_i32_0 = arith.constant 0 : i32
    %c0_i32_1 = arith.constant 0 : i32
    return %arg0, %c0_i32, %c0_i32_0 : i32, i32, i32
  }
}

</mosaic_0001>

<bundles_post_ra>
// kernel: tpu_custom_call.1
= control target key start
LH: loop header
LB: loop body
LE: loop exit
PB: predicated region body
PF: predicated region fallthrough
CT: control target
= control target key end

     0   :  { %7 = vsyncpa [#allocation3], 0  ;;  %s814_s0 = inlined_call_operand.hbm [shape: f32[8,32], index: 0, kind: input, shape index: {}]   ;;  %s815_s1 = inlined_call_operand.hbm [shape: f32[2,32,256], index: 1, kind: input, shape index: {}]   ;;  %s816_s2 = inlined_call_operand.hbm [shape: f32[2,8,256], index: 2, kind: output, shape index: {}]  }
   0x1   :  { %8 = vsyncpa [#allocation6], 0 }
   0x2   :  { %10 = vsyncpa [#allocation6 + $0x1], 0 }
   0x3   :  { %11 = vsyncpa [#allocation4], 0 }
   0x4   :  { %13 = vsyncpa [#allocation4 + $0x1], 0  ;;  %s617_s9 = smov 0   ;;  %s619_s10 = smov 0  }
   0x5   :  { %s621_s11 = smov 0   ;;  %s623_s12 = smov 0  }
   0x6 LB: > { %s638_s13 = sadd.s32 4294967295, %s594_s12   ;;  %s373_s14 = sadd.s32 4294967294, %s594_s12   ;;  %s594_s12 = sphi %s623_s12, %s841_s12   ;;  %s590_s11 = sphi %s621_s11, %s840_s11   ;;  %s586_s10 = sphi %s619_s10, %s839_s10   ;;  %s582_s9 = sphi %s617_s9, %s838_s9  }
   0x7   : > { %s642_s15 = sadd.s32 1, %s594_s12   ;;  %s47_s16 = sadd.s32 1, %s590_s11 }
   0x8   : > { %s44_s17 = ssub.s32 %s594_s12, %s642_s15  ;;  %p54_p0 = scmp.ne.s32.totalorder %s590_s11, %s586_s10 }
   0x9   : > { %p45_p1 = scmp.eq.s32.totalorder %s44_s17, 0  ;;  %p55_p2 = scmp.eq.s32.totalorder %s594_s12, 0 }
   0xa   : > { %p60_p3 = scmp.ne.s32.totalorder %s586_s10, %s582_s9  ;;  %p817_p4 = scmp.eq.s32.totalorder %s638_s13, 0 }
   0xb   : > { %s654_s18 = scalar_select %p45_p1, %s590_s11, %s47_s16  }
   0xc   : > { %p656_p5 = por %p55_p2, %p54_p0  ;;  %p662_p6 = por %p817_p4, %p60_p3 }
   0xd   : > { %p84_p7 = scmp.eq.s32.totalorder %s638_s13, 1  ;;  %p90_p8 = scmp.eq.s32.totalorder %s373_s14, 1 }
   0xe   : > { %s823_s20 = scalar_select %p662_p6, 1, 0 }
   0xf   : > { %p374_p9 = scmp.ge.s32.totalorder %s594_s12, 1  ;;  %p97_p10 = scmp.lt.s32.totalorder %s594_s12, 3 }
  0x10   : > { %p669_p11 = por %p84_p7, %p54_p0  ;;  %p673_p12 = por %p90_p8, %p60_p3 }
  0x11   : > { %p677_p13 = pnand %p374_p9, %p97_p10  ;;  %s596_s24 = smov [#allocation2]  }
  0x12   : > { %s824_s21 = scalar_select %p669_p11, 1, 0 }
  0x13   : > { %s825_s22 = scalar_select %p673_p12, 1, 0 }
  0x14   : > { %s826_s23 = scalar_select %p677_p13, 1, 0 }
  0x15   : > { %p408_p2 = pneg %p677_p13  ;;  %s110_s25 = sshll.u32 %s596_s24, 4  ;;  %s111_s25 = int_to_ptr.vmem [resolvable:$true] %s110_s25 }
  0x16   : > { %p421_p4 = scmp.lt.s32.totalorder %s594_s12, 2  ;;  %p827_p0 = scmp.eq.s32.totalorder %s638_s13, 0 }
  0x17   : > { %s121_s27 = sand.u32 1, %s590_s11   ;;  %s466_s4 = scalar_lea.hbm %s814_s0, 128 }
  0x18   : > { %p687_p7 = pnand %p408_p2, %p827_p0  ;;  %p694_p3 = pnand %p421_p4, %p656_p5 }
  0x19   : > { %s377_s29 = sshll.u32 %s121_s27, 6  ;;  %p467_p8 = scmp.ne.s32.totalorder %s814_s0, %s466_s4 }
  0x1a   : > { %s829_s28 = scalar_select %p694_p3, 1, 0 }
  0x1b   : > { %p468_p9 = pneg %p687_p7  ;;  %p473_p4 = scmp.lt.u32.totalorder %s466_s4, %s814_s0 }
  0x1d   : > { %p469_p10 = pnand %p468_p9, %p467_p8 }
  0x1f   : > { %p470_p2 = pneg %p469_p10 }
  0x21   : > { %p475_p5 = pnand %p473_p4, %p470_p2 }
  0x23   : > { %478 = shalt.err (!%p475_p5)
}
  0x24   : > { %s479_s14 = scalar_lea.vmem %s111_s25, 128  ;;  %p487_p11 = scmp.lt.s32.totalorder %s111_s25, %s111_s25 }
  0x25   : > { %p480_p0 = scmp.ne.s32.totalorder %s111_s25, %s479_s14  ;;  %p488_p6 = scmp.lt.s32.totalorder %s479_s14, %s479_s14 }
  0x27   : > { %p482_p1 = pnand %p480_p0, %p468_p9  ;;  %p489_p13 = por %p488_p6, %p487_p11 }
  0x29   : > { %p483_p12 = pneg %p482_p1 }
  0x2b   : > { %p490_p3 = pnand %p489_p13, %p483_p12 }
  0x2d   : > { %493 = shalt.err (!%p490_p3)
}
  0x2e   : > { %411 = dma.hbm_to_vmem [thread:$0]  (!%p687_p7), %s814_s0, 128, %s111_s25, [#allocation3]  }
  0x2f   : > { %s390_s19 = sshll.u32 %s594_s12, 10  ;;  %s125_s24 = scalar_lea.vmem [#allocation5], %s377_s29 }
  0x30   : > { %s132_s30 = sshll.u32 %s125_s24, 4  ;;  %s718_s5 = scalar_lea.hbm %s815_s1, %s390_s19  ;;  %s720_s30 = int_to_ptr.vmem [resolvable:$true] %s132_s30 }
  0x31   : > { %s722_s26 = scalar_lea.sflag [#allocation6], %s121_s27  ;;  %s494_s6 = scalar_lea.hbm %s718_s5, 1024 }
  0x32   : > { %p495_p6 = scmp.ne.s32.totalorder %s718_s5, %s494_s6  ;;  %p830_p11 = scmp.ne.s32.totalorder %s829_s28, 0 }
  0x33   : > { %s499_s7 = scalar_lea.hbm %s815_s1, 2048  ;;  %p500_p7 = scmp.lt.u32.totalorder %s718_s5, %s815_s1 }
  0x34   : > { %p496_p12 = pneg %p830_p11  ;;  %p501_p3 = scmp.lt.u32.totalorder %s499_s7, %s494_s6 }
  0x35   : > { %p503_p9 = scmp.lt.u32.totalorder %s494_s6, %s718_s5 }
  0x36   : > { %p497_p13 = pnand %p496_p12, %p495_p6  ;;  %p502_p8 = por %p501_p3, %p500_p7 }
  0x38   : > { %p498_p1 = pneg %p497_p13  ;;  %p504_p10 = por %p503_p9, %p502_p8 }
  0x3a   : > { %p505_p2 = pnand %p504_p10, %p498_p1 }
  0x3c   : > { %508 = shalt.err (!%p505_p2)
}
  0x3d   : > { %s509_s27 = scalar_lea.vmem %s720_s30, 1024  ;;  %s597_s16 = smov [#allocation5]  }
  0x3e   : > { %p510_p4 = scmp.ne.s32.totalorder %s720_s30, %s509_s27  ;;  %s514_s17 = sshll.u32 %s597_s16, 4  ;;  %s515_s17 = int_to_ptr.vmem [resolvable:$false] %s514_s17 }
  0x3f   : > { %s516_s19 = scalar_lea.vmem %s515_s17, 2048  ;;  %p517_p6 = scmp.lt.s32.totalorder %s720_s30, %s515_s17 }
  0x40   : > { %p512_p5 = pnand %p510_p4, %p496_p12  ;;  %p518_p13 = scmp.lt.s32.totalorder %s516_s19, %s509_s27 }
  0x42   : > { %p513_p0 = pneg %p512_p5  ;;  %p519_p7 = por %p518_p13, %p517_p6 }
  0x44   : > { %p520_p3 = pnand %p519_p7, %p513_p0 }
  0x46   : > { %523 = shalt.err (!%p520_p3)
}
  0x47   : > { %s598_s24 = smov 256   ;;  %s599_s3 = smov 16  }
  0x48   : > { %415 = dma.hbm_to_vmem [thread:$0]  (!%p830_p11), %s718_s5, 1024, %s720_s30, %s722_s26, %s598_s24, %s598_s24, %s599_s3  }
  0x49   : > { %p831_p12 = scmp.ne.s32.totalorder %s826_s23, 0 }
  0x4a   : > { %p832_p1 = scmp.eq.s32.totalorder (!%p831_p12), %s638_s13, 0 }
  0x4b   : > { %144 = sbr.rel (%p831_p12) target bundleno = 642 (0x282), region = 28 }
  0x52   : > { %569 = dma.done.wait (%p832_p1), [#allocation3], 128   ;;  %p833_p8 = pmov %p832_p1 }
  0x53   : > { %s757_s4 = sand.u32 1, %s586_s10   ;;  %p834_p9 = scmp.ne.s32.totalorder %s823_s20, 0 }
  0x54   : > { %571 = vsyncadd (%p833_p8), [#allocation3], 4294967168  ;;  %s382_s6 = sshll.u32 %s757_s4, 6  ;;  %s151_s25 = scalar_lea.sflag [#allocation6], %s757_s4 }
  0x55   : > { %s154_s29 = scalar_lea.vmem [#allocation5], %s382_s6 }
  0x56   : > { %573 = dma.done.wait (%p834_p9), %s151_s25, 1024  }
  0x57   : > { %575 = vsyncadd (%p834_p9), %s151_s25, 4294966272  ;;  %v600_v0 = vmov 0.0   ;;  %v177_v1 = vld [vmem:[%s154_s29 + $0x8] sm:$0xff]  ;;  %v179_v2 = vld [vmem:[%s154_s29 + $0x18] sm:$0xff]  ;;  %vm184_vm0 = vcmask 261120   ;;  %s383_s20 = sshll.u32 %s757_s4, 4 }
  0x58   : > { %252 = vmatprep.mubr.f32.mxu0 %v600_v0  ;;  %v176_v3 = vld [vmem:[%s154_s29] sm:$0xff]  ;;  %v392_v4 = vpack.c.bf16 %v179_v2, %v177_v1  ;;  %v178_v5 = vld [vmem:[%s154_s29 + $0x10] sm:$0xff]  ;;  %v181_v6 = vld [vmem:[%s154_s29 + $0x28] sm:$0xff]  ;;  %s391_s23 = sshll.u32 %s638_s13, 8  ;;  %s174_s28 = scalar_lea.vmem [#allocation7], %s383_s20 }
  0x59   : > { %v183_v7 = vld [vmem:[%s154_s29 + $0x38] sm:$0xff]  ;;  %v394_v8 = vpack.c.bf16 %v178_v5, %v176_v3  ;;  %v180_v10 = vld [vmem:[%s154_s29 + $0x20] sm:$0xff]  ;;  %v182_v11 = vld [vmem:[%s154_s29 + $0x30] sm:$0xff]  ;;  %s291_s30 = sshll.u32 %s174_s28, 4  ;;  %s770_s7 = scalar_lea.hbm %s816_s2, %s391_s23  ;;  %s772_s30 = int_to_ptr.vmem [resolvable:$true] %s291_s30 }
  0x5a   : > { %v396_v9 = vpack.c.bf16 %v183_v7, %v181_v6  ;;  %393 = vmatprep.subr.bf16.mxu0 %v392_v4  ;;  %v398_v12 = vpack.c.bf16 %v182_v11, %v180_v10  ;;  %v175_v13 = vld [vmem:[#allocation2] sm:$0xff]  ;;  %s277_s8 = scalar_lea.sflag [#allocation4], %s757_s4  ;;  %s524_s14 = scalar_lea.vmem %s772_s30, 256 }
  0x5b   : > { %395 = vmatpush1.bf16.msra.mxu0 %v394_v8  ;;  %p525_p11 = scmp.ne.s32.totalorder %s772_s30, %s524_s14  ;;  %p835_p10 = scmp.ne.s32.totalorder %s824_s21, 0 }
  0x5c   : > { %397 = vmatprep.subr.bf16.mxu0 %v396_v9  ;;  %s601_s13 = smov [#allocation7]  }
  0x5d   : > { %p526_p2 = pnand %p525_p11, %p835_p10  ;;  %s528_s27 = sshll.u32 %s601_s13, 4  ;;  %s529_s27 = int_to_ptr.vmem [resolvable:$false] %s528_s27 }
  0x5e   : > { %s530_s16 = scalar_lea.vmem %s529_s27, 512  ;;  %p531_p5 = scmp.lt.s32.totalorder %s772_s30, %s529_s27 }
  0x5f   : > { %399 = vmatpush1.bf16.msra.mxu0 %v398_v12  ;;  %p527_p4 = pneg %p526_p2  ;;  %p532_p0 = scmp.lt.s32.totalorder %s530_s16, %s524_s14 }
  0x61   : > { %p533_p6 = por %p532_p0, %p531_p5 }
  0x62   : > { %384 = vmatmul.mubr.msk.f32.vlgmr.msra.gmra.mrb[0].mxu0 %vm184_vm0, %v175_v13 }
  0x63   : > { %p534_p13 = pnand %p533_p6, %p527_p4 }
 0x135   : > { %v254_v14 = vpop.f32.mrb[0].mxu0 }
 0x136   : > { %v256_v15 = vpop.f32.mrb[1].mxu0 }
 0x137   : > { %v259_v16 = vmax.f32 %v254_v14, %v256_v15 }
 0x139   : > { %260 = vmax.xlane.f32.xlu0 %v259_v16 }
 0x1c6   : > { %v261_v17 = vpop.xlane.xlu0 %260 }
 0x1c7   : > { %v262_v18 = vsub.f32 %v254_v14, %v261_v17  ;;  %v263_v19 = vsub.f32 %v256_v15, %v261_v17 }
 0x1c9   : > { %v264_v20 = vmul.f32 1.442695, %v262_v18  ;;  %v266_v21 = vmul.f32 1.442695, %v263_v19 }
 0x1cb   : > { %460 = vpow2.f32 %v264_v20 }
 0x1cc   : > { %462 = vpow2.f32 %v266_v21 }
 0x1d5   : > { %v461_v22 = vpop.eup %460 }
 0x1d6   : > { %v463_v23 = vpop.eup %462 }
 0x1d7   : > { %v268_v24 = vadd.f32 %v463_v23, %v461_v22 }
 0x1d9   : > { %269 = vadd.xlane.f32.xlu0 %v268_v24 }
 0x266   : > { %v270_v25 = vpop.xlane.xlu0 %269 }
 0x267   : > { %464 = vrcp.f32 %v270_v25 }
 0x271   : > { %v465_v26 = vpop.eup %464 }
 0x272   : > { %v272_v27 = vmul.f32 %v465_v26, %v461_v22  ;;  %v273_v28 = vmul.f32 %v465_v26, %v463_v23 }
 0x274   : > { %274 = vst [vmem:[%s174_s28] sm:$0xff] %v272_v27  ;;  %275 = vst [vmem:[%s174_s28 + $0x8] sm:$0xff] %v273_v28 }
 0x275   : > { %537 = shalt.err (!%p534_p13)
}
 0x276   : > { %s538_s17 = scalar_lea.hbm %s770_s7, 256  ;;  %s542_s3 = scalar_lea.hbm %s816_s2, 512 }
 0x277   : > { %p539_p7 = scmp.ne.s32.totalorder %s770_s7, %s538_s17  ;;  %p543_p1 = scmp.lt.u32.totalorder %s770_s7, %s816_s2 }
 0x278   : > { %p544_p8 = scmp.lt.u32.totalorder %s542_s3, %s538_s17  ;;  %p546_p11 = scmp.lt.u32.totalorder %s538_s17, %s770_s7 }
 0x279   : > { %p540_p3 = pnand %p539_p7, %p835_p10 }
 0x27a   : > { %p545_p9 = por %p544_p8, %p543_p1 }
 0x27b   : > { %p541_p12 = pneg %p540_p3 }
 0x27c   : > { %p547_p2 = por %p546_p11, %p545_p9 }
 0x27e   : > { %p548_p4 = pnand %p547_p2, %p541_p12 }
 0x280   : > { %551 = shalt.err (!%p548_p4)
}
 0x281   : > { %406 = dma.vmem_to_hbm [thread:$0]  (%p835_p10), %s772_s30, 256, %s770_s7, %s277_s8  }
 0x282 PF: > { %s303_s25 = sand.u32 1, %s582_s9   ;;  %p836_p5 = scmp.ne.s32.totalorder %s825_s22, 0 }
 0x283   : > { %p837_p0 = scmp.ge.s32.totalorder %s594_s12, 2  ;;  %s304_s29 = scalar_lea.sflag [#allocation4], %s303_s25 }
 0x285   : > { %p417_p6 = pnand %p837_p0, %p836_p5 }
 0x287   : > { %577 = dma.done.wait (!%p417_p6), %s304_s29, 256  }
 0x288   : > { %579 = vsyncadd (!%p417_p6), %s304_s29, 4294967040  ;;  %p16_p13 = scmp.ge.s32.totalorder %s642_s15, 4   ;;  %s838_s9 = smov %s586_s10 }
 0x289   : > { %s839_s10 = smov %s590_s11  ;;  %s840_s11 = smov %s654_s18 }
 0x28a   : > { %s841_s12 = smov %s642_s15  ;;  %18 = sbr.rel (!%p16_p13) target bundleno = 6 (0x6), region = 78 }
 0x291   :  { %309 = vsyncpa [#allocation3], 1 }
 0x292   :  { %311 = vsyncpa [#allocation3 + $0x1], 1 }
 0x293   :  { %312 = vsyncpa [#allocation6], 1 }
 0x294   :  { %314 = vsyncpa [#allocation6 + $0x1], 1 }
 0x295   :  { %315 = vsyncpa [#allocation4], 1 }
 0x296   :  { %317 = vsyncpa [#allocation4 + $0x1], 1 }

</bundles_post_ra>
